<compile_context>
chip_gen: v7x
topology: tpu7x:2x2x1
jax: 0.10.0
libtpu: 0.0.40
codegen_flags: <defaults>
</compile_context>

<pallas_src>
import functools

import jax
import jax.numpy as jnp
from jax.experimental import pallas as pl
from jax.experimental.pallas import tpu as pltpu

_EPS = 1e-6  # matches torch.nn.functional.pairwise_distance default eps


def _contrastive_loss_kernel(margin_ref, a_ref, p_ref, n_ref, out_ref, acc_ref,
                             *, n_valid, inv_n, has_pad):
    i = pl.program_id(0)
    tb = a_ref.shape[0]

    @pl.when(i == 0)
    def _():
        acc_ref[...] = jnp.zeros_like(acc_ref)

    a = a_ref[...].astype(jnp.float32)
    p = p_ref[...].astype(jnp.float32)
    n = n_ref[...].astype(jnp.float32)

    # F.pairwise_distance adds eps to the element-wise difference before the norm.
    dp = a - p + _EPS
    dn = a - n + _EPS

    # Positive branch: only pos_dist**2 is needed -> skip the sqrt entirely.
    pos_sq = jnp.sum(dp * dp, axis=-1, keepdims=True)                # (TB, 1)
    neg_dist = jnp.sqrt(jnp.sum(dn * dn, axis=-1, keepdims=True))    # (TB, 1)

    margin = margin_ref[0, 0]
    hinge = jnp.maximum(margin - neg_dist, 0.0)                      # clamp(margin - d, 0)
    per_sample = pos_sq + hinge * hinge                              # (TB, 1)

    if has_pad:
        # Zero out the contribution of padded rows (only when B % TB != 0).
        row = i * tb + jax.lax.broadcasted_iota(jnp.int32, (tb, 1), 0)
        per_sample = jnp.where(row < n_valid, per_sample, 0.0)

    acc_ref[...] += jnp.sum(per_sample, axis=0, keepdims=True)       # (1, 1)

    @pl.when(i == pl.num_programs(0) - 1)
    def _():
        out_ref[...] = acc_ref[...] * inv_n


def contrastive_loss(anchor, positive, negative, margin=1.0):
    """Pallas TPU implementation of ContrastiveLoss.forward. Returns a scalar f32."""
    assert anchor.shape == positive.shape == negative.shape
    assert anchor.ndim == 2, "expected (batch, feature) inputs"

    B, D = anchor.shape

    # Batch tile: biggest multiple of 8 (capped at 512) such that
    # 3 inputs x 2 pipeline buffers x TB x D stays well inside default scoped VMEM.
    itemsize = jnp.dtype(anchor.dtype).itemsize
    bytes_per_row = 3 * 2 * D * itemsize
    budget = 12 * 1024 * 1024
    tb_cap = max(8, (budget // max(bytes_per_row, 1)) // 8 * 8)
    tb = int(min(512, tb_cap, ((B + 7) // 8) * 8))

    grid_b = pl.cdiv(B, tb)
    b_pad = grid_b * tb
    if b_pad != B:
        pad = ((0, b_pad - B), (0, 0))
        anchor = jnp.pad(anchor, pad)
        positive = jnp.pad(positive, pad)
        negative = jnp.pad(negative, pad)

    # Margin as a runtime SMEM scalar -> no recompile per margin value.
    margin_arr = jnp.full((1, 1), margin, dtype=jnp.float32)

    kernel = functools.partial(
        _contrastive_loss_kernel,
        n_valid=B,
        inv_n=float(1.0 / B),
        has_pad=(b_pad != B),
    )

    out = pl.pallas_call(
        kernel,
        out_shape=jax.ShapeDtypeStruct((1, 1), jnp.float32),
        grid=(grid_b,),
        in_specs=[
            pl.BlockSpec(memory_space=pltpu.MemorySpace.SMEM),   # margin scalar
            pl.BlockSpec((tb, D), lambda i: (i, 0)),             # anchor tile
            pl.BlockSpec((tb, D), lambda i: (i, 0)),             # positive tile
            pl.BlockSpec((tb, D), lambda i: (i, 0)),             # negative tile
        ],
        out_specs=pl.BlockSpec((1, 1), lambda i: (0, 0)),
        scratch_shapes=[pltpu.VMEM((1, 1), jnp.float32)],        # running sum
        compiler_params=pltpu.CompilerParams(
            dimension_semantics=("arbitrary",)),                 # reduction axis
    )(margin_arr, anchor, positive, negative)
    return out[0, 0]


def _reference_loss(anchor, positive, negative, margin=1.0):
    """Pure-JAX reference mirroring the PyTorch forward, for verification."""
    a = anchor.astype(jnp.float32)
    p = positive.astype(jnp.float32)
    n = negative.astype(jnp.float32)
    pos_dist = jnp.sqrt(jnp.sum((a - p + _EPS) ** 2, axis=-1))
    neg_dist = jnp.sqrt(jnp.sum((a - n + _EPS) ** 2, axis=-1))
    return jnp.mean(pos_dist ** 2 + jnp.maximum(margin - neg_dist, 0.0) ** 2)


if __name__ == "__main__":
    key = jax.random.PRNGKey(0)

    # Primary small test: batch divisible by the tile.
    B, D = 8, 32
    k_a, k_p, k_n, key = jax.random.split(key, 4)
    anchor = jax.random.normal(k_a, (B, D), dtype=jnp.float32)
    positive = jax.random.normal(k_p, (B, D), dtype=jnp.float32)
    negative = jax.random.normal(k_n, (B, D), dtype=jnp.float32)

    loss = contrastive_loss(anchor, positive, negative, margin=1.0)
    loss = jax.block_until_ready(loss)
    ref = _reference_loss(anchor, positive, negative, margin=1.0)
    assert jnp.allclose(loss, ref, rtol=1e-5, atol=1e-5), (loss, ref)

    # Secondary test: batch not a multiple of 8 (exercises the padding mask).
    B2, D2 = 12, 32
    k_a, k_p, k_n, key = jax.random.split(key, 4)
    anchor2 = jax.random.normal(k_a, (B2, D2), dtype=jnp.float32)
    positive2 = jax.random.normal(k_p, (B2, D2), dtype=jnp.float32)
    negative2 = jax.random.normal(k_n, (B2, D2), dtype=jnp.float32)

    loss2 = contrastive_loss(anchor2, positive2, negative2, margin=0.75)
    loss2 = jax.block_until_ready(loss2)
    ref2 = _reference_loss(anchor2, positive2, negative2, margin=0.75)
    assert jnp.allclose(loss2, ref2, rtol=1e-5, atol=1e-5), (loss2, ref2)

    # Tertiary test: bf16 inputs (in-kernel cast path, halves HBM traffic).
    B3, D3 = 16, 32
    k_a, k_p, k_n, key = jax.random.split(key, 4)
    anchor3 = jax.random.normal(k_a, (B3, D3), dtype=jnp.bfloat16)
    positive3 = jax.random.normal(k_p, (B3, D3), dtype=jnp.bfloat16)
    negative3 = jax.random.normal(k_n, (B3, D3), dtype=jnp.bfloat16)

    loss3 = contrastive_loss(anchor3, positive3, negative3, margin=1.0)
    loss3 = jax.block_until_ready(loss3)
    ref3 = _reference_loss(anchor3, positive3, negative3, margin=1.0)
    assert jnp.allclose(loss3, ref3, rtol=1e-5, atol=1e-5), (loss3, ref3)

    print("KERNEL_OK")
</pallas_src>

<mosaic_0001>
module attributes {stable_mosaic.version = 11 : i64} {
  func.func @_contrastive_loss_kernel(%arg0: i32, %arg1: memref<1x1xf32, #tpu.memory_space<smem>>, %arg2: memref<8x32xf32, #tpu.memory_space<vmem>>, %arg3: memref<8x32xf32, #tpu.memory_space<vmem>>, %arg4: memref<8x32xf32, #tpu.memory_space<vmem>>, %arg5: memref<1x1xf32, #tpu.memory_space<vmem>>, %arg6: memref<1x1xf32, #tpu.memory_space<vmem>>) attributes {dimension_semantics = [#tpu.dimension_semantics<arbitrary>], iteration_bounds = array<i64: 1>, scalar_prefetch = 0 : i64, scratch_operands = 1 : i64, tpu.core_type = #tpu.core_type<tc>, window_params = [{transform_indices = @transform_0, window_bounds = array<i64: 1, 1>}, {transform_indices = @transform_1, window_bounds = array<i64: 8, 32>}, {transform_indices = @transform_2, window_bounds = array<i64: 8, 32>}, {transform_indices = @transform_3, window_bounds = array<i64: 8, 32>}, {pipeline_mode = #tpu.pipeline_mode<synchronous>, transform_indices = @transform_4, window_bounds = array<i64: 1, 1>}]} {
    %c0_i32 = arith.constant 0 : i32
    %0 = arith.cmpi eq, %arg0, %c0_i32 : i32
    %1 = arith.extui %0 : i1 to i32
    %c0_i32_0 = arith.constant 0 : i32
    %2 = arith.cmpi ne, %1, %c0_i32_0 : i32
    scf.if %2 {
      %cst_19 = arith.constant 0.000000e+00 : f32
      %34 = vector.broadcast %cst_19 : f32 to vector<1x1xf32>
      %c0_20 = arith.constant 0 : index
      %c0_21 = arith.constant 0 : index
      %35 = vector.load %arg6[%c0_20, %c0_21] : memref<1x1xf32, #tpu.memory_space<vmem>>, vector<1x1xf32>
      tpu.vector_store %arg6[%c0_20, %c0_21], %34 {strides = array<i32>} : memref<1x1xf32, #tpu.memory_space<vmem>>, vector<1x1xf32>,
    } else {
    }
    %c0 = arith.constant 0 : index
    %c0_1 = arith.constant 0 : index
    %3 = vector.load %arg2[%c0, %c0_1] : memref<8x32xf32, #tpu.memory_space<vmem>>, vector<8x32xf32>
    %c0_2 = arith.constant 0 : index
    %c0_3 = arith.constant 0 : index
    %4 = vector.load %arg3[%c0_2, %c0_3] : memref<8x32xf32, #tpu.memory_space<vmem>>, vector<8x32xf32>
    %c0_4 = arith.constant 0 : index
    %c0_5 = arith.constant 0 : index
    %5 = vector.load %arg4[%c0_4, %c0_5] : memref<8x32xf32, #tpu.memory_space<vmem>>, vector<8x32xf32>
    %6 = arith.subf %3, %4 : vector<8x32xf32>
    %cst = arith.constant 9.99999997E-7 : f32
    %7 = vector.broadcast %cst : f32 to vector<8x32xf32>
    %8 = arith.addf %6, %7 : vector<8x32xf32>
    %9 = arith.subf %3, %5 : vector<8x32xf32>
    %cst_6 = arith.constant 9.99999997E-7 : f32
    %10 = vector.broadcast %cst_6 : f32 to vector<8x32xf32>
    %11 = arith.addf %9, %10 : vector<8x32xf32>
    %12 = arith.mulf %8, %8 : vector<8x32xf32>
    %cst_7 = arith.constant dense<0.000000e+00> : vector<8xf32>
    %13 = vector.multi_reduction <add>, %12, %cst_7 [1] : vector<8x32xf32> to vector<8xf32>
    %14 = vector.shape_cast %13 : vector<8xf32> to vector<8x1xf32>
    %15 = arith.mulf %11, %11 : vector<8x32xf32>
    %cst_8 = arith.constant dense<0.000000e+00> : vector<8xf32>
    %16 = vector.multi_reduction <add>, %15, %cst_8 [1] : vector<8x32xf32> to vector<8xf32>
    %17 = vector.shape_cast %16 : vector<8xf32> to vector<8x1xf32>
    %18 = math.sqrt %17 : vector<8x1xf32>
    %c0_9 = arith.constant 0 : index
    %c0_10 = arith.constant 0 : index
    %19 = memref.load %arg1[%c0_9, %c0_10] : memref<1x1xf32, #tpu.memory_space<smem>>
    %20 = vector.broadcast %19 : f32 to vector<8x1xf32>
    %21 = arith.subf %20, %18 : vector<8x1xf32>
    %cst_11 = arith.constant 0.000000e+00 : f32
    %22 = vector.broadcast %cst_11 : f32 to vector<8x1xf32>
    %23 = arith.maximumf %21, %22 : vector<8x1xf32>
    %24 = arith.mulf %23, %23 : vector<8x1xf32>
    %25 = arith.addf %14, %24 : vector<8x1xf32>
    %c0_12 = arith.constant 0 : index
    %c0_13 = arith.constant 0 : index
    %26 = vector.load %arg6[%c0_12, %c0_13] : memref<1x1xf32, #tpu.memory_space<vmem>>, vector<1x1xf32>
    %cst_14 = arith.constant dense<0.000000e+00> : vector<1xf32>
    %27 = vector.multi_reduction <add>, %25, %cst_14 [0] : vector<8x1xf32> to vector<1xf32>
    %28 = vector.shape_cast %27 : vector<1xf32> to vector<1x1xf32>
    %29 = arith.addf %26, %28 : vector<1x1xf32>
    %c0_15 = arith.constant 0 : index
    %c0_16 = arith.constant 0 : index
    %30 = vector.load %arg6[%c0_15, %c0_16] : memref<1x1xf32, #tpu.memory_space<vmem>>, vector<1x1xf32>
    tpu.vector_store %arg6[%c0_15, %c0_16], %29 {strides = array<i32>} : memref<1x1xf32, #tpu.memory_space<vmem>>, vector<1x1xf32>,
    %c0_i32_17 = arith.constant 0 : i32
    %31 = arith.cmpi eq, %arg0, %c0_i32_17 : i32
    %32 = arith.extui %31 : i1 to i32
    %c0_i32_18 = arith.constant 0 : i32
    %33 = arith.cmpi ne, %32, %c0_i32_18 : i32
    scf.if %33 {
      %c0_19 = arith.constant 0 : index
      %c0_20 = arith.constant 0 : index
      %34 = vector.load %arg6[%c0_19, %c0_20] : memref<1x1xf32, #tpu.memory_space<vmem>>, vector<1x1xf32>
      %cst_21 = arith.constant 1.250000e-01 : f32
      %35 = vector.broadcast %cst_21 : f32 to vector<1x1xf32>
      %36 = arith.mulf %34, %35 : vector<1x1xf32>
      %c0_22 = arith.constant 0 : index
      %c0_23 = arith.constant 0 : index
      %37 = vector.load %arg5[%c0_22, %c0_23] : memref<1x1xf32, #tpu.memory_space<vmem>>, vector<1x1xf32>
      tpu.vector_store %arg5[%c0_22, %c0_23], %36 {strides = array<i32>} : memref<1x1xf32, #tpu.memory_space<vmem>>, vector<1x1xf32>,
    } else {
    }
    return
  }
  func.func @transform_0(%arg0: i32) -> (i32, i32) {
    %c0_i32 = arith.constant 0 : i32
    %c0_i32_0 = arith.constant 0 : i32
    %c0_i32_1 = arith.constant 0 : i32
    return %c0_i32, %c0_i32_0 : i32, i32
  }
  func.func @transform_1(%arg0: i32) -> (i32, i32) {
    %c0_i32 = arith.constant 0 : i32
    %c0_i32_0 = arith.constant 0 : i32
    return %arg0, %c0_i32 : i32, i32
  }
  func.func @transform_2(%arg0: i32) -> (i32, i32) {
    %c0_i32 = arith.constant 0 : i32
    %c0_i32_0 = arith.constant 0 : i32
    return %arg0, %c0_i32 : i32, i32
  }
  func.func @transform_3(%arg0: i32) -> (i32, i32) {
    %c0_i32 = arith.constant 0 : i32
    %c0_i32_0 = arith.constant 0 : i32
    return %arg0, %c0_i32 : i32, i32
  }
  func.func @transform_4(%arg0: i32) -> (i32, i32) {
    %c0_i32 = arith.constant 0 : i32
    %c0_i32_0 = arith.constant 0 : i32
    %c0_i32_1 = arith.constant 0 : i32
    return %c0_i32, %c0_i32_0 : i32, i32
  }
}

</mosaic_0001>

<bundles_post_ra>
// kernel: tpu_custom_call.1
= control target key start
LH: loop header
LB: loop body
LE: loop exit
PB: predicated region body
PF: predicated region fallthrough
CT: control target
= control target key end

     0   :  { %10 = vsyncpa [#allocation5], 0  ;;  %s262_s0 = inlined_call_operand.<no memory space> [shape: f32[1,1], index: 0, kind: input, shape index: {}]   ;;  %s263_s1 = inlined_call_operand.hbm [shape: f32[8,32], index: 1, kind: input, shape index: {}]   ;;  %s264_s2 = inlined_call_operand.hbm [shape: f32[8,32], index: 2, kind: input, shape index: {}]   ;;  %s265_s3 = inlined_call_operand.vmem [shape: f32[8,32], index: 3, kind: input, shape index: {}]   ;;  %s266_s4 = inlined_call_operand.hbm [shape: f32[1,1], index: 4, kind: output, shape index: {}]  }
   0x1   :  { %11 = vsyncpa [#allocation8], 0 }
   0x2   :  { %12 = vsyncpa [#allocation6], 0  ;;  %s188_s15 = smov [#allocation4]   ;;  %s189_s17 = smov [#allocation7]  }
   0x3   :  { %s21_s16 = sshll.u32 %s188_s15, 4  ;;  %s31_s18 = sshll.u32 %s189_s17, 4  ;;  %s22_s16 = int_to_ptr.vmem [resolvable:$true] %s21_s16  ;;  %s32_s18 = int_to_ptr.vmem [resolvable:$true] %s31_s18 }
   0x4   :  { %s116_s21 = scalar_lea.hbm %s263_s1, 128 }
   0x5   :  { %p117_p0 = scmp.ne.s32.totalorder %s263_s1, %s116_s21  ;;  %p120_p1 = scmp.lt.u32.totalorder %s116_s21, %s263_s1 }
   0x7   :  { %p122_p2 = pnand %p120_p1, %p117_p0 }
   0x9   :  { %125 = shalt.err (!%p122_p2)
}
   0xa   :  { %s126_s26 = scalar_lea.vmem %s22_s16, 128  ;;  %p131_p4 = scmp.lt.s32.totalorder %s22_s16, %s22_s16 }
   0xb   :  { %p127_p3 = scmp.ne.s32.totalorder %s22_s16, %s126_s26  ;;  %p132_p5 = scmp.lt.s32.totalorder %s126_s26, %s126_s26 }
   0xd   :  { %p133_p6 = por %p132_p5, %p131_p4 }
   0xf   :  { %p134_p7 = pnand %p133_p6, %p127_p3 }
  0x11   :  { %137 = shalt.err (!%p134_p7)
}
  0x12   :  { %24 = dma.hbm_to_vmem [thread:$0]  %s263_s1, 128, %s22_s16, [#allocation5]  }
  0x13   :  { %s138_s5 = scalar_lea.hbm %s264_s2, 128 }
  0x14   :  { %p139_p8 = scmp.ne.s32.totalorder %s264_s2, %s138_s5  ;;  %p142_p9 = scmp.lt.u32.totalorder %s138_s5, %s264_s2 }
  0x16   :  { %p144_p10 = pnand %p142_p9, %p139_p8 }
  0x18   :  { %147 = shalt.err (!%p144_p10)
}
  0x19   :  { %s148_s10 = scalar_lea.vmem %s32_s18, 128  ;;  %p153_p12 = scmp.lt.s32.totalorder %s32_s18, %s32_s18 }
  0x1a   :  { %p149_p11 = scmp.ne.s32.totalorder %s32_s18, %s148_s10  ;;  %p154_p13 = scmp.lt.s32.totalorder %s148_s10, %s148_s10 }
  0x1c   :  { %p155_p0 = por %p154_p13, %p153_p12 }
  0x1e   :  { %p156_p1 = pnand %p155_p0, %p149_p11 }
  0x20   :  { %159 = shalt.err (!%p156_p1)
}
  0x21   :  { %34 = dma.hbm_to_vmem [thread:$0]  %s264_s2, 128, %s32_s18, [#allocation8]  }
  0x22   :  { %182 = dma.done.wait [#allocation5], 128  }
  0x23   :  { %183 = vsyncadd [#allocation5], 4294967168 }
  0x24   :  { %184 = dma.done.wait [#allocation8], 128  }
  0x25   :  { %185 = vsyncadd [#allocation8], 4294967168  ;;  %v49_v0 = vld [vmem:[#allocation4] sm:$0xff]  ;;  %v50_v2 = vld [vmem:[#allocation7] sm:$0xff]  ;;  %vm57_vm0 = vcmask 261120   ;;  %vm47_vm1 = vcmask 0   ;;  %v73_v16 = vstv %s262_s0 }
  0x26   :  { %v51_v1 = vld [vmem:[%s265_s3] sm:$0xff]  ;;  %v52_v4 = vsub.f32 %v49_v0, %v50_v2  ;;  %v190_v11 = vmov 0.0   ;;  %s191_s14 = smov [#allocation9]  }
  0x27   :  { %v54_v3 = vsub.f32 %v49_v0, %v51_v1  ;;  %48 = vst.msk [vmem:[#allocation2] sm:$0x1] %vm47_vm1, %v190_v11  ;;  %s100_s0 = sshll.u32 %s191_s14, 4  ;;  %s101_s0 = int_to_ptr.vmem [resolvable:$true] %s100_s0 }
  0x28   :  { %v53_v6 = vadd.f32 1e-06, %v52_v4  ;;  %s160_s15 = scalar_lea.vmem %s101_s0, 16  ;;  %s164_s16 = scalar_lea.vmem %s101_s0, 32 }
  0x29   :  { %v55_v5 = vadd.f32 1e-06, %v54_v3  ;;  %p161_p2 = scmp.ne.s32.totalorder %s101_s0, %s160_s15  ;;  %p165_p3 = scmp.lt.s32.totalorder %s101_s0, %s101_s0 }
  0x2a   :  { %v56_v8 = vmul.f32 %v53_v6, %v53_v6  ;;  %p166_p4 = scmp.lt.s32.totalorder %s164_s16, %s160_s15 }
  0x2b   :  { %v61_v7 = vmul.f32 %v55_v5, %v55_v5 }
  0x2c   :  { %v58_v10 = vsel %vm57_vm0, %v56_v8, 0.0  ;;  %p167_p5 = por %p166_p4, %p165_p3 }
  0x2d   :  { %v62_v9 = vsel %vm57_vm0, %v61_v7, 0.0 }
  0x2e   :  { %63 = vadd.xlane.f32.xlu0 %v62_v9  ;;  %v78_v29 = vld [vmem:[#allocation2] sm:$0x1]  ;;  %p168_p6 = pnand %p167_p5, %p161_p2 }
  0x32   :  { %59 = vadd.xlane.f32.xlu0 %v58_v10 }
  0xbb   :  { %v64_v12 = vpop.xlane.xlu0 %63 }
  0xbc   :  { %114 = vrsqrt.f32 %v64_v12  ;;  %vm67_vm2 = vcmp.eq.f32.partialorder %v64_v12, inf  ;;  %v70_v15 = vand.u32 2147483648, %v64_v12  ;;  %vm69_vm3 = vcmp.eq.f32.partialorder %v64_v12, 0.0 }
  0xbf   :  { %v60_v21 = vpop.xlane.xlu0 %59 }
  0xc6   :  { %v115_v13 = vpop.eup %114 }
  0xc7   :  { %v66_v14 = vmul.f32 %v115_v13, %v64_v12 }
  0xc9   :  { %v68_v17 = vsel %vm67_vm2, %v64_v12, %v66_v14 }
  0xca   :  { %v71_v18 = vsel %vm69_vm3, %v70_v15, %v68_v17 }
  0xcb   :  { %v74_v19 = vsub.f32 %v73_v16, %v71_v18 }
  0xcd   :  { %v75_v20 = vmax.f32 %v74_v19, 0.0 }
  0xcf   :  { %v76_v22 = vmul.f32 %v75_v20, %v75_v20 }
  0xd1   :  { %v77_v23 = vadd.f32 %v76_v22, %v60_v21 }
  0xd3   :  { %v79_v24 = vrot.slane %v77_v23, 4 }
  0xd5   :  { %v80_v25 = vadd.f32 %v79_v24, %v77_v23 }
  0xd7   :  { %v81_v26 = vrot.slane %v80_v25, 2 }
  0xd9   :  { %v82_v27 = vadd.f32 %v81_v26, %v80_v25 }
  0xdb   :  { %v83_v28 = vrot.slane %v82_v27, 1 }
  0xdd   :  { %v84_v30 = vadd.f32 %v83_v28, %v82_v27 }
  0xdf   :  { %v85_v31 = vadd.f32 %v84_v30, %v78_v29 }
  0xe1   :  { %87 = vst.msk [vmem:[#allocation2] sm:$0x1] %vm47_vm1, %v85_v31 }
  0xe8   :  { %v91_v32 = vld [vmem:[#allocation2] sm:$0x1] }
  0xe9   :  { %v92_v33 = vmul.f32 0.125, %v91_v32 }
  0xeb   :  { %93 = vst.msk [vmem:[#allocation9] sm:$0x1] %vm47_vm1, %v92_v33 }
  0xec   :  { %171 = shalt.err (!%p168_p6)
}
  0xed   :  { %s172_s19 = scalar_lea.hbm %s266_s4, 16 }
  0xee   :  { %p173_p7 = scmp.ne.s32.totalorder %s266_s4, %s172_s19  ;;  %p176_p8 = scmp.lt.u32.totalorder %s172_s19, %s266_s4 }
  0xf0   :  { %p178_p9 = pnand %p176_p8, %p173_p7 }
  0xf2   :  { %181 = shalt.err (!%p178_p9)
}
  0xf3   :  { %103 = dma.vmem_to_hbm [thread:$0]  %s101_s0, 16, %s266_s4, [#allocation6]  }
  0xf4   :  { %186 = dma.done.wait [#allocation6], 16  }
  0xf5   :  { %187 = vsyncadd [#allocation6], 4294967280 }
  0xf6   :  { %107 = vsyncpa [#allocation5], 1 }
  0xf7   :  { %108 = vsyncpa [#allocation8], 1 }
  0xf8   :  { %109 = vsyncpa [#allocation6], 1 }

</bundles_post_ra>
